<compile_context>
chip_gen: v6e
topology: v6e:2x2x1
jax: 0.10.0
libtpu: 0.0.40
codegen_flags: <defaults>
</compile_context>

<pallas_src>
import functools

import jax
import jax.numpy as jnp
import numpy as np
from jax.experimental import pallas as pl
from jax.experimental.pallas import tpu as pltpu


# ----------------------------- Pallas kernels ------------------------------ #

def _qkv_kernel(x_ref, w_ref, o_ref):
    # 1x1 conv (no bias) == plain matmul over channels: (TILE_M, C) @ (C, 3*inner).
    # f32 accumulation on the MXU; emit bf16 to halve the HBM write and downstream reads.
    o_ref[...] = jnp.dot(
        x_ref[...], w_ref[...], preferred_element_type=jnp.float32
    ).astype(o_ref.dtype)


def _attn_kernel(qkv_ref, rh_ref, rw_ref, o_ref, *, heads, dim_head, H, W, scale):
    # One batch element (all heads) per grid step.
    N = H * W
    D = dim_head
    inner = heads * D

    x = qkv_ref[0]          # (N, 3*inner) bf16, lane-dense load (channel layout: qkv, head, d)
    rh = rh_ref[...]        # (H, H, D) f32: rh[x, u, :] = rel_height[u - x + H - 1]
    rw = rw_ref[...]        # (W, W, D) f32: rw[y, v, :] = rel_width [v - y + W - 1]

    outs = []
    for h in range(heads):  # static unroll, heads is small
        qh = x[:, h * D:(h + 1) * D]                             # (N, D) bf16
        kh = x[:, inner + h * D: inner + (h + 1) * D]            # (N, D) bf16
        vh = x[:, 2 * inner + h * D: 2 * inner + (h + 1) * D]    # (N, D) bf16

        # content logits on the MXU (bf16 inputs, f32 accumulation)
        sim = jax.lax.dot_general(
            qh, kh, (((1,), (1,)), ((), ())), preferred_element_type=jnp.float32
        )  # (N, N)

        # relative-position logits, decomposed per spatial axis:
        #   ph[x, y, u] = q[x, y, :] . rel_height[u - x + H - 1]
        #   pw[x, y, v] = q[x, y, :] . rel_width [v - y + W - 1]
        # O(N*(H+W)*D) work (negligible next to the MXU matmuls) instead of the old
        # O(N^2*D) broadcast against a materialized (N, N, D) bias tensor.
        q3 = qh.astype(jnp.float32).reshape(H, W, D)
        ph = jnp.sum(q3[:, :, None, :] * rh[:, None, :, :], axis=-1)   # (H, W, H)
        pw = jnp.sum(q3[:, :, None, :] * rw[None, :, :, :], axis=-1)   # (H, W, W)
        pos = (ph[:, :, :, None] + pw[:, :, None, :]).reshape(N, N)

        # scale folded in here (equivalent to scaling q before both terms)
        logits = (sim + pos) * scale

        # softmax over keys, statistics in f32; divide -> EUP reciprocal + post-matmul rescale
        m = jnp.max(logits, axis=-1, keepdims=True)
        p = jnp.exp(logits - m)
        denom = jnp.sum(p, axis=-1, keepdims=True)
        out_h = jnp.dot(p.astype(jnp.bfloat16), vh,
                        preferred_element_type=jnp.float32)            # (N, D)
        out_h = out_h * pl.reciprocal(denom, approx=True)
        outs.append(out_h)

    # single lane-dense store: (N, heads*D), heads*D >= 128 lanes
    o_ref[0] = jnp.concatenate(outs, axis=-1).astype(o_ref.dtype)


# ------------------------------ Wrapper ------------------------------------ #

def bot_attention(fmap, w_qkv, rel_height, rel_width, *, heads, dim_head):
    """Pallas equivalent of BoT Attention.forward with RelPosEmb.

    fmap:       (B, C, H, W) float32 (NCHW)
    w_qkv:      (3*heads*dim_head, C)  -- Conv2d(dim, inner*3, 1, bias=False) weight[:, :, 0, 0]
    rel_height: (2H-1, dim_head)
    rel_width:  (2W-1, dim_head)
    returns:    (B, heads*dim_head, H, W)
    """
    B, C, H, W = fmap.shape
    N = H * W
    D = dim_head
    inner = heads * D
    scale = D ** -0.5

    # ---- glue: NCHW -> tokens (B*N, C); conv weight -> (C, 3*inner) ----
    x2d = jnp.transpose(fmap, (0, 2, 3, 1)).reshape(B * N, C)
    w2d = jnp.transpose(w_qkv, (1, 0))

    # ---- kernel 1: 1x1 conv as a row-tiled matmul, bf16 output ----
    BN = B * N
    tile_m = BN
    for cand in (512, 256, 128, 64, 32, 16, 8):
        if BN % cand == 0:
            tile_m = cand
            break
    qkv = pl.pallas_call(
        _qkv_kernel,
        out_shape=jax.ShapeDtypeStruct((BN, 3 * inner), jnp.bfloat16),
        grid=(BN // tile_m,),
        in_specs=[
            pl.BlockSpec((tile_m, C), lambda i: (i, 0)),
            pl.BlockSpec((C, 3 * inner), lambda i: (0, 0)),
        ],
        out_specs=pl.BlockSpec((tile_m, 3 * inner), lambda i: (i, 0)),
        compiler_params=pltpu.CompilerParams(dimension_semantics=("parallel",)),
    )(x2d, w2d)

    # pure view, no inter-kernel data movement (channel layout: (qkv, head, dim_head))
    qkv3 = qkv.reshape(B, N, 3 * inner)

    # ---- parameter-only setup: gather rel tables to absolute offsets (tiny) ----
    # This is what RelPosEmb's rel_to_abs / expand_dim rearrangement computes, but it only
    # depends on the parameters, so it is built once here and consumed in-kernel.
    idx_h = jnp.arange(H)[None, :] - jnp.arange(H)[:, None] + (H - 1)   # [x, u] -> u - x + H - 1
    idx_w = jnp.arange(W)[None, :] - jnp.arange(W)[:, None] + (W - 1)   # [y, v] -> v - y + W - 1
    RH = rel_height[idx_h].astype(jnp.float32)   # (H, H, D)
    RW = rel_width[idx_w].astype(jnp.float32)    # (W, W, D)

    # ---- kernel 2: attention (QK^T + decomposed rel-pos bias + softmax + AV) ----
    # NOTE: for large feature maps, the key axis should be tiled with an online
    # (flash-style) softmax so the (N, N) f32 logits never exceed VMEM (matters on v7x).
    kernel = functools.partial(
        _attn_kernel, heads=heads, dim_head=D, H=H, W=W, scale=scale)
    out_tokens = pl.pallas_call(
        kernel,
        out_shape=jax.ShapeDtypeStruct((B, N, inner), jnp.float32),
        grid=(B,),
        in_specs=[
            pl.BlockSpec((1, N, 3 * inner), lambda b: (b, 0, 0)),
            pl.BlockSpec((H, H, D), lambda b: (0, 0, 0)),
            pl.BlockSpec((W, W, D), lambda b: (0, 0, 0)),
        ],
        out_specs=pl.BlockSpec((1, N, inner), lambda b: (b, 0, 0)),
        compiler_params=pltpu.CompilerParams(dimension_semantics=("parallel",)),
    )(qkv3, RH, RW)

    # ---- glue: 'b (x y) (h d) -> b (h d) x y' ----
    out = jnp.transpose(out_tokens, (0, 2, 1)).reshape(B, inner, H, W)
    return out


# --------------------- Pure-JAX reference (literal port) ------------------- #

def _rel_to_abs_ref(x):
    b, h, l, _ = x.shape
    x = jnp.concatenate([x, jnp.zeros((b, h, l, 1), x.dtype)], axis=3)
    flat_x = x.reshape(b, h, l * 2 * l)
    flat_x = jnp.concatenate([flat_x, jnp.zeros((b, h, l - 1), x.dtype)], axis=2)
    final = flat_x.reshape(b, h, l + 1, 2 * l - 1)
    return final[:, :, :l, l - 1:]


def _relative_logits_1d_ref(q, rel_k):
    b, heads, h, w, _ = q.shape
    logits = jnp.einsum('bhxyd,rd->bhxyr', q, rel_k)
    logits = logits.reshape(b, heads * h, w, 2 * w - 1)
    logits = _rel_to_abs_ref(logits)
    logits = logits.reshape(b, heads, h, w, w)
    logits = jnp.broadcast_to(logits[:, :, :, None, :, :], (b, heads, h, h, w, w))
    return logits


def _attention_ref(fmap, w_qkv, rel_height, rel_width, *, heads, dim_head):
    B, C, H, W = fmap.shape
    D = dim_head
    scale = D ** -0.5
    qkv = jnp.einsum('bcxy,oc->boxy', fmap, w_qkv)
    q, k, v = jnp.split(qkv, 3, axis=1)

    def rearr(t):  # 'b (h d) x y -> b h (x y) d'
        return t.reshape(B, heads, D, H, W).transpose(0, 1, 3, 4, 2).reshape(B, heads, H * W, D)

    q, k, v = rearr(q), rearr(k), rearr(v)
    q = q * scale
    sim = jnp.einsum('bhid,bhjd->bhij', q, k)

    q5 = q.reshape(B, heads, H, W, D)
    rlw = _relative_logits_1d_ref(q5, rel_width)                      # (B,heads,H,H,W,W)
    rlw = rlw.transpose(0, 1, 2, 4, 3, 5).reshape(B, heads, H * W, H * W)
    q5t = q5.transpose(0, 1, 3, 2, 4)                                 # (B,heads,W,H,D)
    rlh = _relative_logits_1d_ref(q5t, rel_height)                    # (B,heads,W,W,H,H)
    rlh = rlh.transpose(0, 1, 4, 2, 5, 3).reshape(B, heads, H * W, H * W)
    sim = sim + rlw + rlh

    attn = jax.nn.softmax(sim, axis=-1)
    out = jnp.einsum('bhij,bhjd->bhid', attn, v)
    out = out.reshape(B, heads, H, W, D).transpose(0, 1, 4, 2, 3).reshape(B, heads * D, H, W)
    return out


# --------------------------------- Main ------------------------------------ #

if __name__ == "__main__":
    B, C, H, W = 2, 16, 8, 8
    heads, dim_head = 4, 32          # heads*dim_head = 128 -> lane-dense output stores
    inner = heads * dim_head
    scale = dim_head ** -0.5

    key = jax.random.PRNGKey(0)
    k1, k2, k3, k4 = jax.random.split(key, 4)
    fmap = jax.random.normal(k1, (B, C, H, W), jnp.float32)
    w_qkv = jax.random.normal(k2, (3 * inner, C), jnp.float32) * (C ** -0.5)
    rel_height = jax.random.normal(k3, (2 * H - 1, dim_head), jnp.float32) * scale
    rel_width = jax.random.normal(k4, (2 * W - 1, dim_head), jnp.float32) * scale

    out = bot_attention(fmap, w_qkv, rel_height, rel_width, heads=heads, dim_head=dim_head)
    out = jax.block_until_ready(out)
    assert out.shape == (B, inner, H, W)

    ref = _attention_ref(fmap, w_qkv, rel_height, rel_width, heads=heads, dim_head=dim_head)
    # kernels run their matmuls in bf16 (f32 accumulation) -> compare at bf16-level tolerance
    np.testing.assert_allclose(np.asarray(out), np.asarray(ref), rtol=3e-2, atol=3e-2)

    print("KERNEL_OK")
</pallas_src>

<mosaic_0001>
module attributes {stable_mosaic.version = 11 : i64} {
  func.func @_qkv_kernel(%arg0: i32, %arg1: memref<128x16xf32, #tpu.memory_space<vmem>>, %arg2: memref<16x384xf32, #tpu.memory_space<vmem>>, %arg3: memref<128x384xbf16, #tpu.memory_space<vmem>>) attributes {dimension_semantics = [#tpu.dimension_semantics<parallel>], iteration_bounds = array<i64: 1>, scalar_prefetch = 0 : i64, scratch_operands = 0 : i64, tpu.core_type = #tpu.core_type<tc>, window_params = [{transform_indices = @transform_0, window_bounds = array<i64: 128, 16>}, {pipeline_mode = #tpu.pipeline_mode<synchronous>, transform_indices = @transform_1, window_bounds = array<i64: 16, 384>}, {transform_indices = @transform_2, window_bounds = array<i64: 128, 384>}]} {
    %c0 = arith.constant 0 : index
    %c0_0 = arith.constant 0 : index
    %0 = vector.load %arg1[%c0, %c0_0] : memref<128x16xf32, #tpu.memory_space<vmem>>, vector<128x16xf32>
    %c0_1 = arith.constant 0 : index
    %c0_2 = arith.constant 0 : index
    %1 = vector.load %arg2[%c0_1, %c0_2] : memref<16x384xf32, #tpu.memory_space<vmem>>, vector<16x384xf32>
    %cst = arith.constant dense<0.000000e+00> : vector<128x384xf32>
    %2 = tpu.matmul %0, %1, %cst {dimension_numbers = #tpu.dot_dimension_numbers<[1], [0], [0], [1], [0, 0, 1, 1], [], []>} : vector<128x16xf32>, vector<16x384xf32>, vector<128x384xf32> -> vector<128x384xf32>
    %3 = arith.truncf %2 : vector<128x384xf32> to vector<128x384xbf16>
    %c0_3 = arith.constant 0 : index
    %c0_4 = arith.constant 0 : index
    %4 = vector.load %arg3[%c0_3, %c0_4] : memref<128x384xbf16, #tpu.memory_space<vmem>>, vector<128x384xbf16>
    tpu.vector_store %arg3[%c0_3, %c0_4], %3 {strides = array<i32>} : memref<128x384xbf16, #tpu.memory_space<vmem>>, vector<128x384xbf16>,
    return
  }
  func.func @transform_0(%arg0: i32) -> (i32, i32) {
    %c0_i32 = arith.constant 0 : i32
    %c0_i32_0 = arith.constant 0 : i32
    return %arg0, %c0_i32 : i32, i32
  }
  func.func @transform_1(%arg0: i32) -> (i32, i32) {
    %c0_i32 = arith.constant 0 : i32
    %c0_i32_0 = arith.constant 0 : i32
    %c0_i32_1 = arith.constant 0 : i32
    return %c0_i32, %c0_i32_0 : i32, i32
  }
  func.func @transform_2(%arg0: i32) -> (i32, i32) {
    %c0_i32 = arith.constant 0 : i32
    %c0_i32_0 = arith.constant 0 : i32
    return %arg0, %c0_i32 : i32, i32
  }
}

</mosaic_0001>

<bundles_post_ra>
// kernel: tpu_custom_call.1
= control target key start
LH: loop header
LB: loop body
LE: loop exit
PB: predicated region body
PF: predicated region fallthrough
CT: control target
= control target key end

     0   :  { %vm34_vm0 = vcmask 130048   ;;  %v769_v7 = vmov 0.0   ;;  %s909_s0 = inlined_call_operand.vmem [shape: f32[128,16], index: 0, kind: input, shape index: {}]   ;;  %s910_s1 = inlined_call_operand.vmem [shape: f32[16,384], index: 1, kind: input, shape index: {}]   ;;  %s911_s2 = inlined_call_operand.hbm [shape: bf16[128,384], index: 2, kind: output, shape index: {}]  }
   0x1   :  { %v32_v0 = vld [vmem:[%s910_s1 + $0x20] sm:$0xff]  ;;  %v31_v1 = vld [vmem:[%s910_s1 + $0x18] sm:$0xff]  ;;  %v29_v2 = vld [vmem:[%s910_s1 + $0x8] sm:$0xff]  ;;  %147 = vmatprep.mubr.f32.mxu0 %v769_v7  ;;  %219 = vmatprep.mubr.f32.mxu1 %v769_v7 }
   0x2   :  { %111 = vmatprep.subr.mxu0 %v32_v0  ;;  %739 = vmatprep.subr.mxu1 %v32_v0  ;;  %v28_v3 = vld [vmem:[%s910_s1] sm:$0xff]  ;;  %v33_v6 = vld [vmem:[%s910_s1 + $0x28] sm:$0xff]  ;;  %v30_v8 = vld [vmem:[%s910_s1 + $0x10] sm:$0xff] }
   0x3   :  { %112 = vmatpush1.msra.mxu0 %v31_v1  ;;  %741 = vmatpush1.msra.mxu1 %v31_v1  ;;  %v12_v4 = vld [vmem:[%s909_s0] sm:$0xff]  ;;  %v13_v9 = vld [vmem:[%s909_s0 + $0x8] sm:$0xff] }
   0x4   :  { %113 = vmatprep.subr.mxu0 %v29_v2  ;;  %740 = vmatprep.subr.mxu1 %v29_v2  ;;  %v806_v5 = vld [vmem:[%s909_s0 + $0x60] sm:$0xff]  ;;  %v25_v10 = vld [vmem:[%s909_s0 + $0x68] sm:$0xff] }
   0x5   :  { %114 = vmatpush1.msra.mxu0 %v28_v3  ;;  %742 = vmatpush1.msra.mxu1 %v28_v3 }
   0x6   :  { %597 = vmatmul.mubr.msk.f32.vlgmr.msra.gmra.mxu0 %vm34_vm0, %v12_v4  ;;  %609 = vmatmul.mubr.msk.f32.vlgmr.msra.gmra.mxu1 %vm34_vm0, %v806_v5 }
   0x7   :  { %711 = vmatprep.subr.mxu1 %v33_v6  ;;  %153 = vmatprep.mubr.f32.mxu0 %v769_v7 }
   0x8   :  { %7 = vsyncpa [#allocation3], 0  ;;  %712 = vmatpush3.msra.mxu1 %v33_v6  ;;  %225 = vmatprep.mubr.f32.mxu1 %v769_v7  ;;  %v14_v11 = vld [vmem:[%s909_s0 + $0x10] sm:$0xff]  ;;  %v15_v13 = vld [vmem:[%s909_s0 + $0x18] sm:$0xff] }
   0x9   :  { %713 = vmatprep.subr.mxu1 %v30_v8  ;;  %v26_v12 = vld [vmem:[%s909_s0 + $0x70] sm:$0xff]  ;;  %v27_v14 = vld [vmem:[%s909_s0 + $0x78] sm:$0xff]  ;;  %v16_v15 = vld [vmem:[%s909_s0 + $0x20] sm:$0xff] }
   0xa   :  { %598 = vmatmul.mubr.msk.f32.gmra.mxu0 %vm34_vm0, %v13_v9  ;;  %610 = vmatmul.mubr.msk.f32.gmra.mxu1 %vm34_vm0, %v25_v10  ;;  %v17_v16 = vld [vmem:[%s909_s0 + $0x28] sm:$0xff]  ;;  %v18_v17 = vld [vmem:[%s909_s0 + $0x30] sm:$0xff]  ;;  %v19_v18 = vld [vmem:[%s909_s0 + $0x38] sm:$0xff] }
   0xb   :  { %159 = vmatprep.mubr.f32.mxu0 %v769_v7  ;;  %231 = vmatprep.mubr.f32.mxu1 %v769_v7  ;;  %v20_v19 = vld [vmem:[%s909_s0 + $0x40] sm:$0xff]  ;;  %v21_v20 = vld [vmem:[%s909_s0 + $0x48] sm:$0xff]  ;;  %v22_v21 = vld [vmem:[%s909_s0 + $0x50] sm:$0xff] }
   0xc   :  { %714 = vmatpush3.msra.mxu1 %v30_v8  ;;  %v23_v22 = vld [vmem:[%s909_s0 + $0x58] sm:$0xff]  ;;  %s770_s0 = smov [#allocation2]  }
   0xd   :  { %s586_s24 = sshll.u32 %s770_s0, 4  ;;  %s587_s24 = int_to_ptr.vmem [resolvable:$true] %s586_s24 }
   0xe   :  { %599 = vmatmul.mubr.msk.f32.gmra.mxu0 %vm34_vm0, %v14_v11  ;;  %611 = vmatmul.mubr.msk.f32.gmra.mxu1 %vm34_vm0, %v26_v12  ;;  %s747_s25 = scalar_lea.vmem %s587_s24, 3072  ;;  %p752_p1 = scmp.lt.s32.totalorder %s587_s24, %s587_s24 }
   0xf   :  { %165 = vmatprep.mubr.f32.mxu0 %v769_v7  ;;  %237 = vmatprep.mubr.f32.mxu1 %v769_v7  ;;  %p748_p0 = scmp.ne.s32.totalorder %s587_s24, %s747_s25  ;;  %p753_p2 = scmp.lt.s32.totalorder %s747_s25, %s747_s25 }
  0x11   :  { %p754_p3 = por %p753_p2, %p752_p1 }
  0x12   :  { %600 = vmatmul.mubr.msk.f32.gmra.mxu0 %vm34_vm0, %v15_v13  ;;  %612 = vmatmul.mubr.msk.f32.gmra.mxu1 %vm34_vm0, %v27_v14 }
  0x13   :  { %171 = vmatprep.mubr.f32.mxu0 %v769_v7  ;;  %715 = vmatprep.mubr.msk.f32.mxu1 %vm34_vm0, %v12_v4  ;;  %p755_p4 = pnand %p754_p3, %p748_p0 }
  0x16   :  { %601 = vmatmul.mubr.msk.f32.gmra.mxu0 %vm34_vm0, %v16_v15  ;;  %716 = vmatmul.mubr.msk.f32.vlgmr.msra.gmra.mxu1 %vm34_vm0, %v13_v9 }
  0x17   :  { %177 = vmatprep.mubr.f32.mxu0 %v769_v7  ;;  %718 = vmatprep.mubr.msk.f32.mxu1 %vm34_vm0, %v14_v11 }
  0x1a   :  { %602 = vmatmul.mubr.msk.f32.gmra.mxu0 %vm34_vm0, %v17_v16  ;;  %719 = vmatmul.mubr.msk.f32.gmra.mxu1 %vm34_vm0, %v15_v13 }
  0x1b   :  { %183 = vmatprep.mubr.f32.mxu0 %v769_v7  ;;  %721 = vmatprep.mubr.msk.f32.mxu1 %vm34_vm0, %v16_v15 }
  0x1e   :  { %603 = vmatmul.mubr.msk.f32.gmra.mxu0 %vm34_vm0, %v18_v17  ;;  %722 = vmatmul.mubr.msk.f32.gmra.mxu1 %vm34_vm0, %v17_v16 }
  0x1f   :  { %189 = vmatprep.mubr.f32.mxu0 %v769_v7  ;;  %724 = vmatprep.mubr.msk.f32.mxu1 %vm34_vm0, %v18_v17 }
  0x22   :  { %604 = vmatmul.mubr.msk.f32.gmra.mxu0 %vm34_vm0, %v19_v18  ;;  %725 = vmatmul.mubr.msk.f32.gmra.mxu1 %vm34_vm0, %v19_v18 }
  0x23   :  { %195 = vmatprep.mubr.f32.mxu0 %v769_v7  ;;  %727 = vmatprep.mubr.msk.f32.mxu1 %vm34_vm0, %v20_v19 }
  0x26   :  { %605 = vmatmul.mubr.msk.f32.gmra.mxu0 %vm34_vm0, %v20_v19  ;;  %728 = vmatmul.mubr.msk.f32.gmra.mxu1 %vm34_vm0, %v21_v20 }
  0x27   :  { %201 = vmatprep.mubr.f32.mxu0 %v769_v7  ;;  %730 = vmatprep.mubr.msk.f32.mxu1 %vm34_vm0, %v22_v21 }
  0x2a   :  { %606 = vmatmul.mubr.msk.f32.gmra.mxu0 %vm34_vm0, %v21_v20  ;;  %731 = vmatmul.mubr.msk.f32.gmra.mxu1 %vm34_vm0, %v23_v22 }
  0x2b   :  { %207 = vmatprep.mubr.f32.mxu0 %v769_v7  ;;  %733 = vmatprep.mubr.msk.f32.mxu1 %vm34_vm0, %v806_v5 }
  0x2e   :  { %607 = vmatmul.mubr.msk.f32.gmra.mxu0 %vm34_vm0, %v22_v21  ;;  %734 = vmatmul.mubr.msk.f32.gmra.mxu1 %vm34_vm0, %v25_v10 }
  0x2f   :  { %213 = vmatprep.mubr.f32.mxu0 %v769_v7  ;;  %736 = vmatprep.mubr.msk.f32.mxu1 %vm34_vm0, %v26_v12 }
  0x32   :  { %608 = vmatmul.mubr.msk.f32.gmra.mxu0 %vm34_vm0, %v23_v22  ;;  %737 = vmatmul.mubr.msk.f32.gmra.mxu1 %vm34_vm0, %v27_v14 }
  0xc6   :  { %v149_v23 = vpop.f32.mrf.mxu0  ;;  %v221_v24 = vpop.f32.mrf.mxu1 }
  0xc8   :  { %v151_v25 = vpop.f32.mrf.mxu0  ;;  %v223_v26 = vpop.f32.mrf.mxu1 }
  0xc9   :  { %v661_v27 = vpack.c.bf16 %v151_v25, %v149_v23  ;;  %v685_v28 = vpack.c.bf16 %v223_v26, %v221_v24 }
  0xca   :  { %v155_v29 = vpop.f32.mrf.mxu0  ;;  %v227_v30 = vpop.f32.mrf.mxu1 }
  0xcb   :  { %549 = vst [vmem:[#allocation2] sm:$0xff] %v661_v27  ;;  %573 = vst [vmem:[#allocation2 + $0x90] sm:$0xff] %v685_v28 }
  0xcc   :  { %v157_v31 = vpop.f32.mrf.mxu0  ;;  %v229_v32 = vpop.f32.mrf.mxu1 }
  0xcd   :  { %v663_v33 = vpack.c.bf16 %v157_v31, %v155_v29  ;;  %v687_v34 = vpack.c.bf16 %v229_v32, %v227_v30 }
  0xce   :  { %v161_v35 = vpop.f32.mrf.mxu0  ;;  %v233_v36 = vpop.f32.mrf.mxu1 }
  0xcf   :  { %551 = vst [vmem:[#allocation2 + $0xc] sm:$0xff] %v663_v33  ;;  %575 = vst [vmem:[#allocation2 + $0x9c] sm:$0xff] %v687_v34 }
  0xd0   :  { %v163_v37 = vpop.f32.mrf.mxu0  ;;  %v235_v38 = vpop.f32.mrf.mxu1 }
  0xd1   :  { %v665_v39 = vpack.c.bf16 %v163_v37, %v161_v35  ;;  %v689_v40 = vpack.c.bf16 %v235_v38, %v233_v36 }
  0xd2   :  { %v167_v41 = vpop.f32.mrf.mxu0  ;;  %v239_v42 = vpop.f32.mrf.mxu1 }
  0xd3   :  { %553 = vst [vmem:[#allocation2 + $0x18] sm:$0xff] %v665_v39  ;;  %577 = vst [vmem:[#allocation2 + $0xa8] sm:$0xff] %v689_v40 }
  0xd4   :  { %v169_v43 = vpop.f32.mrf.mxu0  ;;  %v241_v44 = vpop.f32.mrf.mxu1 }
  0xd5   :  { %v667_v45 = vpack.c.bf16 %v169_v43, %v167_v41  ;;  %v691_v46 = vpack.c.bf16 %v241_v44, %v239_v42 }
  0xd6   :  { %v173_v47 = vpop.f32.mrf.mxu0  ;;  %v717_v48 = vpop.f32.mrf.mxu1 }
  0xd7   :  { %555 = vst [vmem:[#allocation2 + $0x24] sm:$0xff] %v667_v45  ;;  %579 = vst [vmem:[#allocation2 + $0xb4] sm:$0xff] %v691_v46  ;;  %v664_v49 = vpack.c.bf16 %v717_v48, %v717_v48 }
  0xd8   :  { %v175_v50 = vpop.f32.mrf.mxu0  ;;  %v310_v51 = vpop.f32.mrf.mxu1 }
  0xd9   :  { %552 = vst [vmem:[#allocation2 + $0x14] sm:$0xf] %v664_v49  ;;  %v669_v52 = vpack.c.bf16 %v175_v50, %v173_v47  ;;  %v662_v53 = vpack.c.bf16 %v310_v51, %v310_v51 }
  0xda   :  { %v179_v54 = vpop.f32.mrf.mxu0  ;;  %v720_v55 = vpop.f32.mrf.mxu1 }
  0xdb   :  { %557 = vst [vmem:[#allocation2 + $0x30] sm:$0xff] %v669_v52  ;;  %550 = vst [vmem:[#allocation2 + $0x8] sm:$0xf] %v662_v53  ;;  %v668_v56 = vpack.c.bf16 %v720_v55, %v720_v55 }
  0xdc   :  { %v181_v57 = vpop.f32.mrf.mxu0  ;;  %v320_v58 = vpop.f32.mrf.mxu1 }
  0xdd   :  { %556 = vst [vmem:[#allocation2 + $0x2c] sm:$0xf] %v668_v56  ;;  %v671_v59 = vpack.c.bf16 %v181_v57, %v179_v54  ;;  %v666_v60 = vpack.c.bf16 %v320_v58, %v320_v58 }
  0xde   :  { %v185_v61 = vpop.f32.mrf.mxu0  ;;  %v723_v62 = vpop.f32.mrf.mxu1 }
  0xdf   :  { %559 = vst [vmem:[#allocation2 + $0x3c] sm:$0xff] %v671_v59  ;;  %554 = vst [vmem:[#allocation2 + $0x20] sm:$0xf] %v666_v60  ;;  %v672_v63 = vpack.c.bf16 %v723_v62, %v723_v62 }
  0xe0   :  { %v187_v0 = vpop.f32.mrf.mxu0  ;;  %v330_v1 = vpop.f32.mrf.mxu1 }
  0xe1   :  { %560 = vst [vmem:[#allocation2 + $0x44] sm:$0xf] %v672_v63  ;;  %v673_v2 = vpack.c.bf16 %v187_v0, %v185_v61  ;;  %v670_v3 = vpack.c.bf16 %v330_v1, %v330_v1 }
  0xe2   :  { %v191_v4 = vpop.f32.mrf.mxu0  ;;  %v726_v5 = vpop.f32.mrf.mxu1 }
  0xe3   :  { %561 = vst [vmem:[#allocation2 + $0x48] sm:$0xff] %v673_v2  ;;  %558 = vst [vmem:[#allocation2 + $0x38] sm:$0xf] %v670_v3  ;;  %v676_v6 = vpack.c.bf16 %v726_v5, %v726_v5 }
  0xe4   :  { %v193_v7 = vpop.f32.mrf.mxu0  ;;  %v340_v8 = vpop.f32.mrf.mxu1 }
  0xe5   :  { %564 = vst [vmem:[#allocation2 + $0x5c] sm:$0xf] %v676_v6  ;;  %v675_v9 = vpack.c.bf16 %v193_v7, %v191_v4  ;;  %v674_v10 = vpack.c.bf16 %v340_v8, %v340_v8 }
  0xe6   :  { %v197_v11 = vpop.f32.mrf.mxu0  ;;  %v729_v12 = vpop.f32.mrf.mxu1 }
  0xe7   :  { %563 = vst [vmem:[#allocation2 + $0x54] sm:$0xff] %v675_v9  ;;  %562 = vst [vmem:[#allocation2 + $0x50] sm:$0xf] %v674_v10  ;;  %v680_v13 = vpack.c.bf16 %v729_v12, %v729_v12 }
  0xe8   :  { %v199_v14 = vpop.f32.mrf.mxu0  ;;  %v350_v15 = vpop.f32.mrf.mxu1 }
  0xe9   :  { %568 = vst [vmem:[#allocation2 + $0x74] sm:$0xf] %v680_v13  ;;  %v677_v16 = vpack.c.bf16 %v199_v14, %v197_v11  ;;  %v678_v17 = vpack.c.bf16 %v350_v15, %v350_v15 }
  0xea   :  { %v203_v18 = vpop.f32.mrf.mxu0  ;;  %v732_v19 = vpop.f32.mrf.mxu1 }
  0xeb   :  { %565 = vst [vmem:[#allocation2 + $0x60] sm:$0xff] %v677_v16  ;;  %566 = vst [vmem:[#allocation2 + $0x68] sm:$0xf] %v678_v17  ;;  %v684_v20 = vpack.c.bf16 %v732_v19, %v732_v19 }
  0xec   :  { %v205_v21 = vpop.f32.mrf.mxu0  ;;  %v360_v22 = vpop.f32.mrf.mxu1 }
  0xed   :  { %572 = vst [vmem:[#allocation2 + $0x8c] sm:$0xf] %v684_v20  ;;  %v679_v23 = vpack.c.bf16 %v205_v21, %v203_v18  ;;  %v682_v24 = vpack.c.bf16 %v360_v22, %v360_v22 }
  0xee   :  { %v209_v25 = vpop.f32.mrf.mxu0  ;;  %v735_v26 = vpop.f32.mrf.mxu1 }
  0xef   :  { %567 = vst [vmem:[#allocation2 + $0x6c] sm:$0xff] %v679_v23  ;;  %570 = vst [vmem:[#allocation2 + $0x80] sm:$0xf] %v682_v24  ;;  %v688_v27 = vpack.c.bf16 %v735_v26, %v735_v26 }
  0xf0   :  { %v211_v28 = vpop.f32.mrf.mxu0  ;;  %v370_v29 = vpop.f32.mrf.mxu1 }
  0xf1   :  { %576 = vst [vmem:[#allocation2 + $0xa4] sm:$0xf] %v688_v27  ;;  %v681_v30 = vpack.c.bf16 %v211_v28, %v209_v25  ;;  %v686_v31 = vpack.c.bf16 %v370_v29, %v370_v29 }
  0xf2   :  { %v215_v32 = vpop.f32.mrf.mxu0  ;;  %v738_v33 = vpop.f32.mrf.mxu1 }
  0xf3   :  { %569 = vst [vmem:[#allocation2 + $0x78] sm:$0xff] %v681_v30  ;;  %574 = vst [vmem:[#allocation2 + $0x98] sm:$0xf] %v686_v31  ;;  %v692_v34 = vpack.c.bf16 %v738_v33, %v738_v33 }
  0xf4   :  { %v217_v35 = vpop.f32.mrf.mxu0  ;;  %v380_v36 = vpop.f32.mrf.mxu1 }
  0xf5   :  { %580 = vst [vmem:[#allocation2 + $0xbc] sm:$0xf] %v692_v34  ;;  %v683_v37 = vpack.c.bf16 %v217_v35, %v215_v32  ;;  %v690_v38 = vpack.c.bf16 %v380_v36, %v380_v36 }
  0xf7   :  { %571 = vst [vmem:[#allocation2 + $0x84] sm:$0xff] %v683_v37  ;;  %578 = vst [vmem:[#allocation2 + $0xb0] sm:$0xf] %v690_v38 }
  0xf8   :  { %758 = shalt.err (!%p755_p4)
}
  0xf9   :  { %s771_s26 = smov 192   ;;  %s772_s27 = smov 12  }
  0xfa   :  { %592 = dma.vmem_to_hbm [thread:$0]  %s587_s24, 3072, %s911_s2, [#allocation3], %s771_s26, %s771_s26, %s772_s27  }
  0xfb   :  { %767 = dma.done.wait [#allocation3], 3072  }
  0xfc   :  { %768 = vsyncadd [#allocation3], 4294964224 }
  0xfd   :  { %596 = vsyncpa [#allocation3], 1 }

</bundles_post_ra>
